<compile_context>
chip_gen: v6e
topology: v6e:2x2x1
jax: 0.10.0
libtpu: 0.0.40
codegen_flags: <defaults>
</compile_context>

<pallas_src>
import jax
import jax.numpy as jnp
from jax.experimental import pallas as pl
from jax.experimental.pallas import tpu as pltpu


def local_gconv_kernel(x_ref, w_ref, a_ref, b_ref, o_ref):
    """One grid step = TB batch elements, packed lane-major.

    x_ref: (S, TB*Din)            this block's inputs, batch index on lanes
    w_ref: (TB*Din, K*TB*Dout)    block-diagonal weight panel (resident)
    a_ref: (K, S, S)              all K adjacency samples (resident)
    b_ref: (1, TB*Dout)           bias, pre-tiled over TB (resident)
    o_ref: (S, TB*Dout)           lane-dense output slab for this block
    """
    K = a_ref.shape[0]
    S = o_ref.shape[0]
    TBD = o_ref.shape[1]  # TB * Dout

    # Stage 1: ONE MXU contraction does the projection for all TB batch elements
    # and all K weight matrices:  (S, TB*Din) @ (TB*Din, K*TB*Dout).
    # p[s, k*TBD + t*Dout + e] == (x[t] @ W[k])[s, e]  (batch t stays on lanes).
    p = jnp.dot(x_ref[...], w_ref[...], preferred_element_type=jnp.float32)

    # Stage 2: per-k adjacency aggregation with a lane-dense (S, TB*Dout) RHS.
    # K is small and static, so the Python loop fully unrolls into K MXU issues;
    # each lane slice is at a 128-lane boundary (vreg granularity, no lane shuffles).
    acc = jnp.zeros((S, TBD), jnp.float32)
    for k in range(K):
        acc = acc + jnp.dot(
            a_ref[k],
            p[:, k * TBD:(k + 1) * TBD],
            preferred_element_type=jnp.float32,
        )

    # Fused epilogue: bias + ReLU, single unmasked lane-dense store.
    o_ref[...] = jnp.maximum(acc + b_ref[...], 0.0)


def local_gconv(x, weights, sample_adj, bias, *, tb=4):
    """x: (N, S, Din), weights: (K, Din, Dout), sample_adj: (K, S, S), bias: (Dout,)."""
    N, S, Din = x.shape
    K, _, Dout = weights.shape

    # Pick the batch-block size: default 4 (=> 128-lane output with Dout=32), but
    # keep at least 2 grid steps when N >= 2 so v7x can use both TensorCores.
    tb = max(1, min(tb, N))
    if N >= 2:
        tb = min(tb, (N + 1) // 2)
    G = pl.cdiv(N, tb)
    n_pad = G * tb

    # Pad the batch to a multiple of tb with zero rows (sliced off after the call).
    if n_pad != N:
        x = jnp.concatenate([x, jnp.zeros((n_pad - N, S, Din), x.dtype)], axis=0)

    # Lane-major batch packing: (G, S, tb*Din) so batch sits on lanes inside the
    # kernel (wrapper-side layout plumbing only).
    x_lane = x.reshape(G, tb, S, Din).transpose(0, 2, 1, 3).reshape(G, S, tb * Din)

    # Host-side, one-time parameter prep:
    #  * block-diagonal weight panel: w_bd[t*Din + d, k*tb*Dout + t*Dout + e] = W[k, d, e]
    #    so one matmul projects all tb elements through all K weights with the batch
    #    index staying on lanes.
    eye_tb = jnp.eye(tb, dtype=weights.dtype)
    w_bd = jnp.einsum("tu,kde->tdkue", eye_tb, weights).reshape(tb * Din, K * tb * Dout)
    #  * bias tiled over tb so the epilogue is a single (1, tb*Dout) broadcast add.
    bias_tiled = jnp.tile(bias, tb).reshape(1, tb * Dout)
    # TODO(synk): optionally cast w_bd / sample_adj to bf16 (keep f32 accumulation)
    # if S / K / Dout grow; at these sizes the kernel is overhead-bound, not MXU-bound.

    out_slab = pl.pallas_call(
        local_gconv_kernel,
        out_shape=jax.ShapeDtypeStruct((G, S, tb * Dout), jnp.float32),
        grid_spec=pltpu.PrefetchScalarGridSpec(
            num_scalar_prefetch=0,
            grid=(G,),  # batched "parallel" batch axis only; K handled in-kernel
            in_specs=[
                pl.BlockSpec((None, S, tb * Din), lambda g: (g, 0, 0)),      # x block (leading dim squeezed)
                pl.BlockSpec((tb * Din, K * tb * Dout), lambda g: (0, 0)),   # W block-diag panel (resident)
                pl.BlockSpec((K, S, S), lambda g: (0, 0, 0)),                # all adjacencies (resident)
                pl.BlockSpec((1, tb * Dout), lambda g: (0, 0)),              # tiled bias (resident)
            ],
            out_specs=pl.BlockSpec((None, S, tb * Dout), lambda g: (g, 0, 0)),
        ),
        compiler_params=pltpu.CompilerParams(
            dimension_semantics=("parallel",),
        ),
    )(x_lane, w_bd, sample_adj, bias_tiled)

    # Unscramble the lane-dense slab back to (N, S, Dout) (layout plumbing only).
    out = out_slab.reshape(G, S, tb, Dout).transpose(0, 2, 1, 3).reshape(n_pad, S, Dout)
    return out[:N]


def _xavier_uniform(key, shape):
    fan_in, fan_out = shape[-2], shape[-1]
    bound = (6.0 / (fan_in + fan_out)) ** 0.5
    return jax.random.uniform(key, shape, jnp.float32, minval=-bound, maxval=bound)


if __name__ == "__main__":
    # Module hyper-params (small, consistent with the forward pass):
    K = 4            # number of sampled adjacencies
    S = 43           # local_graph_vert (fixed in the module)
    INPUT_DIM = 16
    OUTPUT_DIM = 32
    N = 8            # batch (2 grid steps with tb=4)

    key = jax.random.PRNGKey(0)
    kx, kw, ka = jax.random.split(key, 3)

    # Deterministic synthetic parameters (xavier-uniform weights as in __init__,
    # small nonzero bias so the add path is exercised).
    weights = jnp.stack(
        [_xavier_uniform(k, (INPUT_DIM, OUTPUT_DIM)) for k in jax.random.split(kw, K)]
    )                                                                  # (K, Din, Dout)
    bias = jnp.linspace(-0.1, 0.1, OUTPUT_DIM, dtype=jnp.float32)      # (Dout,)
    sample_adj = jax.random.uniform(ka, (K, S, S), jnp.float32)        # (K, S, S)
    x = jax.random.normal(kx, (N, S, INPUT_DIM), jnp.float32)          # (N, S, Din)

    out = local_gconv(x, weights, sample_adj, bias)
    out = jax.block_until_ready(out)

    # Pure-JAX reference of the exact PyTorch semantics.
    ref = jnp.zeros((N, S, OUTPUT_DIM), jnp.float32)
    for i in range(K):
        pre_sup = jnp.einsum("ijk,kl->ijl", x, weights[i])
        ref = ref + jnp.einsum("ij,kjl->kil", sample_adj[i], pre_sup)
    ref = jnp.maximum(ref + bias, 0.0)

    assert out.shape == (N, S, OUTPUT_DIM)
    assert jnp.allclose(out, ref, atol=1e-4, rtol=1e-4), "mismatch vs reference"
    print("KERNEL_OK")
</pallas_src>

<mosaic_0001>
module attributes {stable_mosaic.version = 11 : i64} {
  func.func @local_gconv_kernel(%arg0: i32, %arg1: memref<1x43x64xf32, #tpu.memory_space<vmem>>, %arg2: memref<64x512xf32, #tpu.memory_space<vmem>>, %arg3: memref<4x43x43xf32, #tpu.memory_space<vmem>>, %arg4: memref<1x128xf32, #tpu.memory_space<vmem>>, %arg5: memref<1x43x128xf32, #tpu.memory_space<vmem>>) attributes {dimension_semantics = [#tpu.dimension_semantics<parallel>], iteration_bounds = array<i64: 2>, scalar_prefetch = 0 : i64, scratch_operands = 0 : i64, tpu.core_type = #tpu.core_type<tc>, window_params = [{transform_indices = @transform_0, window_bounds = array<i64: 1, 43, 64>}, {pipeline_mode = #tpu.pipeline_mode<synchronous>, transform_indices = @transform_1, window_bounds = array<i64: 64, 512>}, {pipeline_mode = #tpu.pipeline_mode<synchronous>, transform_indices = @transform_2, window_bounds = array<i64: 4, 43, 43>}, {pipeline_mode = #tpu.pipeline_mode<synchronous>, transform_indices = @transform_3, window_bounds = array<i64: 1, 128>}, {transform_indices = @transform_4, window_bounds = array<i64: 1, 43, 128>}]} {
    %c0 = arith.constant 0 : index
    %c0_0 = arith.constant 0 : index
    %c0_1 = arith.constant 0 : index
    %0 = vector.load %arg1[%c0, %c0_0, %c0_1] : memref<1x43x64xf32, #tpu.memory_space<vmem>>, vector<1x43x64xf32>
    %1 = vector.shape_cast %0 : vector<1x43x64xf32> to vector<43x64xf32>
    %c0_2 = arith.constant 0 : index
    %c0_3 = arith.constant 0 : index
    %2 = vector.load %arg2[%c0_2, %c0_3] : memref<64x512xf32, #tpu.memory_space<vmem>>, vector<64x512xf32>
    %cst = arith.constant dense<0.000000e+00> : vector<43x512xf32>
    %3 = tpu.matmul %1, %2, %cst {dimension_numbers = #tpu.dot_dimension_numbers<[1], [0], [0], [1], [0, 0, 1, 1], [], []>} : vector<43x64xf32>, vector<64x512xf32>, vector<43x512xf32> -> vector<43x512xf32>
    %cst_4 = arith.constant 0.000000e+00 : f32
    %4 = vector.broadcast %cst_4 : f32 to vector<43x128xf32>
    %c0_5 = arith.constant 0 : index
    %c0_6 = arith.constant 0 : index
    %c0_7 = arith.constant 0 : index
    %5 = vector.load %arg3[%c0_5, %c0_6, %c0_7] : memref<4x43x43xf32, #tpu.memory_space<vmem>>, vector<1x43x43xf32>
    %6 = vector.shape_cast %5 : vector<1x43x43xf32> to vector<43x43xf32>
    %7 = vector.extract_strided_slice %3 {offsets = [0, 0], sizes = [43, 128], strides = [1, 1]} : vector<43x512xf32> to vector<43x128xf32>
    %cst_8 = arith.constant dense<0.000000e+00> : vector<43x128xf32>
    %8 = tpu.matmul %6, %7, %cst_8 {dimension_numbers = #tpu.dot_dimension_numbers<[1], [0], [0], [1], [0, 0, 1, 1], [], []>} : vector<43x43xf32>, vector<43x128xf32>, vector<43x128xf32> -> vector<43x128xf32>
    %9 = arith.addf %4, %8 : vector<43x128xf32>
    %c1 = arith.constant 1 : index
    %c0_9 = arith.constant 0 : index
    %c0_10 = arith.constant 0 : index
    %10 = vector.load %arg3[%c1, %c0_9, %c0_10] : memref<4x43x43xf32, #tpu.memory_space<vmem>>, vector<1x43x43xf32>
    %11 = vector.shape_cast %10 : vector<1x43x43xf32> to vector<43x43xf32>
    %12 = vector.extract_strided_slice %3 {offsets = [0, 128], sizes = [43, 128], strides = [1, 1]} : vector<43x512xf32> to vector<43x128xf32>
    %cst_11 = arith.constant dense<0.000000e+00> : vector<43x128xf32>
    %13 = tpu.matmul %11, %12, %cst_11 {dimension_numbers = #tpu.dot_dimension_numbers<[1], [0], [0], [1], [0, 0, 1, 1], [], []>} : vector<43x43xf32>, vector<43x128xf32>, vector<43x128xf32> -> vector<43x128xf32>
    %14 = arith.addf %9, %13 : vector<43x128xf32>
    %c2 = arith.constant 2 : index
    %c0_12 = arith.constant 0 : index
    %c0_13 = arith.constant 0 : index
    %15 = vector.load %arg3[%c2, %c0_12, %c0_13] : memref<4x43x43xf32, #tpu.memory_space<vmem>>, vector<1x43x43xf32>
    %16 = vector.shape_cast %15 : vector<1x43x43xf32> to vector<43x43xf32>
    %17 = vector.extract_strided_slice %3 {offsets = [0, 256], sizes = [43, 128], strides = [1, 1]} : vector<43x512xf32> to vector<43x128xf32>
    %cst_14 = arith.constant dense<0.000000e+00> : vector<43x128xf32>
    %18 = tpu.matmul %16, %17, %cst_14 {dimension_numbers = #tpu.dot_dimension_numbers<[1], [0], [0], [1], [0, 0, 1, 1], [], []>} : vector<43x43xf32>, vector<43x128xf32>, vector<43x128xf32> -> vector<43x128xf32>
    %19 = arith.addf %14, %18 : vector<43x128xf32>
    %c3 = arith.constant 3 : index
    %c0_15 = arith.constant 0 : index
    %c0_16 = arith.constant 0 : index
    %20 = vector.load %arg3[%c3, %c0_15, %c0_16] : memref<4x43x43xf32, #tpu.memory_space<vmem>>, vector<1x43x43xf32>
    %21 = vector.shape_cast %20 : vector<1x43x43xf32> to vector<43x43xf32>
    %22 = vector.extract_strided_slice %3 {offsets = [0, 384], sizes = [43, 128], strides = [1, 1]} : vector<43x512xf32> to vector<43x128xf32>
    %cst_17 = arith.constant dense<0.000000e+00> : vector<43x128xf32>
    %23 = tpu.matmul %21, %22, %cst_17 {dimension_numbers = #tpu.dot_dimension_numbers<[1], [0], [0], [1], [0, 0, 1, 1], [], []>} : vector<43x43xf32>, vector<43x128xf32>, vector<43x128xf32> -> vector<43x128xf32>
    %24 = arith.addf %19, %23 : vector<43x128xf32>
    %c0_18 = arith.constant 0 : index
    %c0_19 = arith.constant 0 : index
    %25 = vector.load %arg4[%c0_18, %c0_19] : memref<1x128xf32, #tpu.memory_space<vmem>>, vector<1x128xf32>
    %26 = vector.broadcast %25 : vector<1x128xf32> to vector<43x128xf32>
    %27 = arith.addf %24, %26 : vector<43x128xf32>
    %cst_20 = arith.constant 0.000000e+00 : f32
    %28 = vector.broadcast %cst_20 : f32 to vector<43x128xf32>
    %29 = arith.maximumf %27, %28 : vector<43x128xf32>
    %c0_21 = arith.constant 0 : index
    %c0_22 = arith.constant 0 : index
    %c0_23 = arith.constant 0 : index
    %30 = vector.load %arg5[%c0_21, %c0_22, %c0_23] : memref<1x43x128xf32, #tpu.memory_space<vmem>>, vector<1x43x128xf32>
    %31 = vector.shape_cast %30 : vector<1x43x128xf32> to vector<43x128xf32>
    %32 = vector.shape_cast %29 : vector<43x128xf32> to vector<1x43x128xf32>
    tpu.vector_store %arg5[%c0_21, %c0_22, %c0_23], %32 {strides = array<i32>} : memref<1x43x128xf32, #tpu.memory_space<vmem>>, vector<1x43x128xf32>,
    return
  }
  func.func @transform_0(%arg0: i32) -> (i32, i32, i32) {
    %c0_i32 = arith.constant 0 : i32
    %c0_i32_0 = arith.constant 0 : i32
    %c0_i32_1 = arith.constant 0 : i32
    return %arg0, %c0_i32, %c0_i32_0 : i32, i32, i32
  }
  func.func @transform_1(%arg0: i32) -> (i32, i32) {
    %c0_i32 = arith.constant 0 : i32
    %c0_i32_0 = arith.constant 0 : i32
    %c0_i32_1 = arith.constant 0 : i32
    return %c0_i32, %c0_i32_0 : i32, i32
  }
  func.func @transform_2(%arg0: i32) -> (i32, i32, i32) {
    %c0_i32 = arith.constant 0 : i32
    %c0_i32_0 = arith.constant 0 : i32
    %c0_i32_1 = arith.constant 0 : i32
    %c0_i32_2 = arith.constant 0 : i32
    return %c0_i32, %c0_i32_0, %c0_i32_1 : i32, i32, i32
  }
  func.func @transform_3(%arg0: i32) -> (i32, i32) {
    %c0_i32 = arith.constant 0 : i32
    %c0_i32_0 = arith.constant 0 : i32
    %c0_i32_1 = arith.constant 0 : i32
    return %c0_i32, %c0_i32_0 : i32, i32
  }
  func.func @transform_4(%arg0: i32) -> (i32, i32, i32) {
    %c0_i32 = arith.constant 0 : i32
    %c0_i32_0 = arith.constant 0 : i32
    %c0_i32_1 = arith.constant 0 : i32
    return %arg0, %c0_i32, %c0_i32_0 : i32, i32, i32
  }
}

</mosaic_0001>

<bundles_post_ra>
// kernel: tpu_custom_call.1
= control target key start
LH: loop header
LB: loop body
LE: loop exit
PB: predicated region body
PF: predicated region fallthrough
CT: control target
= control target key end

     0   :  { %s1286_s15 = smov 0   ;;  %s1573_s0 = inlined_call_operand.vmem [shape: f32[2,43,64], index: 0, kind: input, shape index: {}]   ;;  %s1574_s1 = inlined_call_operand.vmem [shape: f32[64,512], index: 1, kind: input, shape index: {}]   ;;  %s1575_s2 = inlined_call_operand.vmem [shape: f32[4,43,43], index: 2, kind: input, shape index: {}]   ;;  %s1576_s3 = inlined_call_operand.vmem [shape: f32[1,128], index: 3, kind: input, shape index: {}]   ;;  %s1577_s4 = inlined_call_operand.vmem [shape: f32[2,43,128], index: 4, kind: output, shape index: {}]  }
   0x1 LB: > { %s1042_s16 = sadd.s32 4294967295, %s1258_s15   ;;  %p1046_p0 = scmp.ge.s32.totalorder %s1258_s15, 1  ;;  %s1258_s15 = sphi %s1286_s15, %s14_s15  }
   0x2   : > { %p162_p1 = scmp.lt.s32.totalorder %s1258_s15, 3 }
   0x4   : > { %p163_p2 = pnand %p1046_p0, %p162_p1 }
   0x5   : > { %p188_p3 = scmp.lt.s32.totalorder (!%p163_p2), %s1042_s16, 1 }
   0x6   : > { %166 = sbr.rel (%p163_p2) target bundleno = 484 (0x1e4), region = 36 }
   0xb   : > { %v233_v0 = vld [vmem:[%s1574_s1 + $0xe8] sm:$0xff]  ;;  %v232_v1 = vld [vmem:[%s1574_s1 + $0xe0] sm:$0xff]  ;;  %v1260_v4 = vmov 0.0   ;;  %v235_v7 = vld [vmem:[%s1574_s1 + $0xf8] sm:$0xff]  ;;  %s1579_s16 = smov (!%p188_p3, %s1042_s16), 1  ;;  %vm236_vm0 = vcmask 523264  }
   0xc   : > { %v229_v2 = vld [vmem:[%s1574_s1 + $0xc8] sm:$0xff]  ;;  %271 = vmatprep.subr.mxu0 %v233_v0  ;;  %v228_v3 = vld [vmem:[%s1574_s1 + $0xc0] sm:$0xff]  ;;  %319 = vmatprep.mubr.f32.mxu0 %v1260_v4  ;;  %v234_v9 = vld [vmem:[%s1574_s1 + $0xf0] sm:$0xff]  ;;  %s1242_s25 = smul.u32 48, %s1579_s16  ;;  %vm470_vm1 = vcmask 351232   ;;  %vm489_vm2 = vcmask 1042432  }
   0xd   : > { %272 = vmatpush1.msra.mxu0 %v232_v1  ;;  %v225_v5 = vld [vmem:[%s1574_s1 + $0xa8] sm:$0xff]  ;;  %420 = vmatprep.mubr.f32.mxu1 %v1260_v4  ;;  %v224_v6 = vld [vmem:[%s1574_s1 + $0xa0] sm:$0xff]  ;;  %v231_v11 = vld [vmem:[%s1574_s1 + $0xd8] sm:$0xff] }
   0xe   : > { %273 = vmatprep.subr.mxu0 %v229_v2  ;;  %v221_v8 = vld [vmem:[%s1574_s1 + $0x88] sm:$0xff]  ;;  %372 = vmatprep.subr.mxu1 %v235_v7  ;;  %v220_v10 = vld [vmem:[%s1574_s1 + $0x80] sm:$0xff]  ;;  %v230_v12 = vld [vmem:[%s1574_s1 + $0xd0] sm:$0xff]  ;;  %s1376_s20 = scalar_lea.vmem %s1573_s0, %s1242_s25 }
   0xf   : > { %274 = vmatpush1.msra.mxu0 %v228_v3  ;;  %373 = vmatpush1.msra.mxu1 %v234_v9  ;;  %v217_v13 = vld [vmem:[%s1574_s1 + $0x68] sm:$0xff]  ;;  %v227_v14 = vld [vmem:[%s1574_s1 + $0xb8] sm:$0xff]  ;;  %v216_v15 = vld [vmem:[%s1574_s1 + $0x60] sm:$0xff] }
  0x10   : > { %275 = vmatprep.subr.mxu0 %v225_v5  ;;  %374 = vmatprep.subr.mxu1 %v231_v11  ;;  %v226_v16 = vld [vmem:[%s1574_s1 + $0xb0] sm:$0xff]  ;;  %v223_v17 = vld [vmem:[%s1574_s1 + $0x98] sm:$0xff]  ;;  %v213_v18 = vld [vmem:[%s1574_s1 + $0x48] sm:$0xff] }
  0x11   : > { %276 = vmatpush1.msra.mxu0 %v224_v6  ;;  %375 = vmatpush1.msra.mxu1 %v230_v12  ;;  %v222_v19 = vld [vmem:[%s1574_s1 + $0x90] sm:$0xff]  ;;  %v212_v20 = vld [vmem:[%s1574_s1 + $0x40] sm:$0xff]  ;;  %v219_v21 = vld [vmem:[%s1574_s1 + $0x78] sm:$0xff] }
  0x12   : > { %277 = vmatprep.subr.mxu0 %v221_v8  ;;  %376 = vmatprep.subr.mxu1 %v227_v14  ;;  %v209_v22 = vld [vmem:[%s1574_s1 + $0x28] sm:$0xff]  ;;  %v218_v23 = vld [vmem:[%s1574_s1 + $0x70] sm:$0xff]  ;;  %v208_v24 = vld [vmem:[%s1574_s1 + $0x20] sm:$0xff] }
  0x13   : > { %278 = vmatpush1.msra.mxu0 %v220_v10  ;;  %377 = vmatpush1.msra.mxu1 %v226_v16  ;;  %v215_v25 = vld [vmem:[%s1574_s1 + $0x58] sm:$0xff]  ;;  %v205_v26 = vld [vmem:[%s1574_s1 + $0x8] sm:$0xff]  ;;  %v214_v27 = vld [vmem:[%s1574_s1 + $0x50] sm:$0xff] }
  0x14   : > { %279 = vmatprep.subr.mxu0 %v217_v13  ;;  %378 = vmatprep.subr.mxu1 %v223_v17  ;;  %v204_v28 = vld [vmem:[%s1574_s1] sm:$0xff]  ;;  %v211_v29 = vld [vmem:[%s1574_s1 + $0x38] sm:$0xff]  ;;  %v210_v31 = vld [vmem:[%s1574_s1 + $0x30] sm:$0xff] }
  0x15   : > { %280 = vmatpush1.msra.mxu0 %v216_v15  ;;  %379 = vmatpush1.msra.mxu1 %v222_v19  ;;  %v198_v30 = vld [vmem:[%s1376_s20] sm:$0xff]  ;;  %v207_v32 = vld [vmem:[%s1574_s1 + $0x18] sm:$0xff]  ;;  %v206_v33 = vld [vmem:[%s1574_s1 + $0x10] sm:$0xff] }
  0x16   : > { %281 = vmatprep.subr.mxu0 %v213_v18  ;;  %380 = vmatprep.subr.mxu1 %v219_v21  ;;  %v199_v34 = vld [vmem:[%s1376_s20 + $0x8] sm:$0xff]  ;;  %v200_v35 = vld [vmem:[%s1376_s20 + $0x10] sm:$0xff]  ;;  %v201_v36 = vld [vmem:[%s1376_s20 + $0x18] sm:$0xff] }
  0x17   : > { %282 = vmatpush1.msra.mxu0 %v212_v20  ;;  %381 = vmatpush1.msra.mxu1 %v218_v23  ;;  %v202_v37 = vld [vmem:[%s1376_s20 + $0x20] sm:$0xff]  ;;  %v203_v38 = vld [vmem:[%s1376_s20 + $0x28] sm:$0x7]  ;;  %v1061_v40 = vld [vmem:[%s1575_s2 + $0x30] sm:$0xff]  ;;  %s1562_s20 = scalar_lea.vmem %s1577_s4, %s1242_s25 }
  0x18   : > { %283 = vmatprep.subr.mxu0 %v209_v22  ;;  %382 = vmatprep.subr.mxu1 %v215_v25  ;;  %v457_v39 = vld [vmem:[%s1575_s2] sm:$0xff]  ;;  %v458_v1 = vld [vmem:[%s1575_s2 + $0x8] sm:$0xff]  ;;  %v1062_v2 = vld [vmem:[%s1575_s2 + $0x38] sm:$0xff] }
  0x19   : > { %284 = vmatpush1.msra.mxu0 %v208_v24  ;;  %383 = vmatpush1.msra.mxu1 %v214_v27  ;;  %v1063_v3 = vld [vmem:[%s1575_s2 + $0x40] sm:$0xff]  ;;  %v459_v5 = vld [vmem:[%s1575_s2 + $0x10] sm:$0xff]  ;;  %v460_v6 = vld [vmem:[%s1575_s2 + $0x18] sm:$0xff] }
  0x1a   : > { %285 = vmatprep.subr.mxu0 %v205_v26  ;;  %384 = vmatprep.subr.mxu1 %v211_v29  ;;  %v1065_v7 = vld [vmem:[%s1575_s2 + $0x50] sm:$0xff]  ;;  %v1066_v8 = vld [vmem:[%s1575_s2 + $0x58] sm:$0x7]  ;;  %v461_v9 = vld [vmem:[%s1575_s2 + $0x20] sm:$0xff] }
  0x1b   : > { %286 = vmatpush1.msra.mxu0 %v204_v28  ;;  %385 = vmatpush1.msra.mxu1 %v210_v31  ;;  %v462_v10 = vld [vmem:[%s1575_s2 + $0x28] sm:$0x7]  ;;  %v1081_v11 = vld [vmem:[%s1575_s2 + $0x60] sm:$0xff]  ;;  %v1094_v12 = vld [vmem:[%s1575_s2 + $0x90] sm:$0xff] }
  0x1c   : > { %1049 = vmatmul.mubr.msk.f32.vlgmr.msra.gmra.mxu0 %vm236_vm0, %v198_v30  ;;  %386 = vmatprep.subr.mxu1 %v207_v32  ;;  %v1082_v13 = vld [vmem:[%s1575_s2 + $0x68] sm:$0xff]  ;;  %v1083_v14 = vld [vmem:[%s1575_s2 + $0x70] sm:$0xff]  ;;  %v1095_v15 = vld [vmem:[%s1575_s2 + $0x98] sm:$0xff] }
  0x1d   : > { %325 = vmatprep.mubr.f32.mxu0 %v1260_v4  ;;  %387 = vmatpush1.msra.mxu1 %v206_v33  ;;  %v1096_v16 = vld [vmem:[%s1575_s2 + $0xa0] sm:$0xff]  ;;  %v1084_v17 = vld [vmem:[%s1575_s2 + $0x78] sm:$0xff]  ;;  %v1097_v19 = vld [vmem:[%s1575_s2 + $0xa8] sm:$0xff] }
  0x1e   : > { %1055 = vmatmul.mubr.msk.f32.vlgmr.msra.gmra.mxu1 %vm236_vm0, %v198_v30  ;;  %v1085_v18 = vld [vmem:[%s1575_s2 + $0x80] sm:$0xff]  ;;  %v1098_v20 = vld [vmem:[%s1575_s2 + $0xb0] sm:$0xff]  ;;  %v1086_v21 = vld [vmem:[%s1575_s2 + $0x88] sm:$0x7] }
  0x1f   : > { %426 = vmatprep.mubr.f32.mxu1 %v1260_v4  ;;  %v1099_v22 = vld [vmem:[%s1575_s2 + $0xb8] sm:$0x7] }
  0x20   : > { %1050 = vmatmul.mubr.msk.f32.gmra.mxu0 %vm236_vm0, %v199_v34 }
  0x21   : > { %331 = vmatprep.mubr.f32.mxu0 %v1260_v4 }
  0x22   : > { %1056 = vmatmul.mubr.msk.f32.gmra.mxu1 %vm236_vm0, %v199_v34 }
  0x23   : > { %432 = vmatprep.mubr.f32.mxu1 %v1260_v4 }
  0x24   : > { %1051 = vmatmul.mubr.msk.f32.gmra.mxu0 %vm236_vm0, %v200_v35 }
  0x25   : > { %337 = vmatprep.mubr.f32.mxu0 %v1260_v4 }
  0x26   : > { %1057 = vmatmul.mubr.msk.f32.gmra.mxu1 %vm236_vm0, %v200_v35 }
  0x27   : > { %438 = vmatprep.mubr.f32.mxu1 %v1260_v4 }
  0x28   : > { %1052 = vmatmul.mubr.msk.f32.gmra.mxu0 %vm236_vm0, %v201_v36 }
  0x29   : > { %343 = vmatprep.mubr.f32.mxu0 %v1260_v4 }
  0x2a   : > { %1058 = vmatmul.mubr.msk.f32.gmra.mxu1 %vm236_vm0, %v201_v36 }
  0x2b   : > { %444 = vmatprep.mubr.f32.mxu1 %v1260_v4 }
  0x2c   : > { %1053 = vmatmul.mubr.msk.f32.gmra.mxu0 %vm236_vm0, %v202_v37 }
  0x2d   : > { %349 = vmatprep.mubr.f32.mxu0 %v1260_v4 }
  0x2e   : > { %1059 = vmatmul.mubr.msk.f32.gmra.mxu1 %vm236_vm0, %v202_v37 }
  0x2f   : > { %450 = vmatprep.mubr.f32.mxu1 %v1260_v4  ;;  %v1064_v4 = vld [vmem:[%s1575_s2 + $0x48] sm:$0xff] }
  0x30   : > { %1054 = vmatmul.mubr.msk.f32.gmra.mxu0 %vm236_vm0, %v203_v38 }
  0x31   : > { %1170 = vmatprep.mubr.msk.f32.mxu0 %vm470_vm1, %v1061_v40 }
  0x32   : > { %1060 = vmatmul.mubr.msk.f32.gmra.mxu1 %vm236_vm0, %v203_v38 }
  0x33   : > { %1191 = vmatprep.mubr.msk.f32.mxu1 %vm470_vm1, %v457_v39 }
  0xdc   : > { %v321_v41 = vpop.f32.mrf.mxu0 }
  0xde   : > { %v323_v42 = vpop.f32.mrf.mxu0  ;;  %v1438_v43 = vpop.f32.mrf.mxu1 }
  0xe0   : > { %v327_v44 = vpop.f32.mrf.mxu0  ;;  %v1440_v45 = vpop.f32.mrf.mxu1 }
  0xe2   : > { %v329_v46 = vpop.f32.mrf.mxu0  ;;  %v1442_v47 = vpop.f32.mrf.mxu1 }
  0xe4   : > { %v333_v48 = vpop.f32.mrf.mxu0  ;;  %v1444_v49 = vpop.f32.mrf.mxu1 }
  0xe6   : > { %v335_v50 = vpop.f32.mrf.mxu0  ;;  %v1446_v51 = vpop.f32.mrf.mxu1 }
  0xe8   : > { %v339_v52 = vpop.f32.mrf.mxu0  ;;  %v436_v53 = vpop.f32.mrf.mxu1 }
  0xea   : > { %v341_v54 = vpop.f32.mrf.mxu0  ;;  %v440_v55 = vpop.f32.mrf.mxu1 }
  0xec   : > { %v345_v56 = vpop.f32.mrf.mxu0  ;;  %v442_v57 = vpop.f32.mrf.mxu1 }
  0xee   : > { %v347_v58 = vpop.f32.mrf.mxu0  ;;  %v446_v59 = vpop.f32.mrf.mxu1 }
  0xf0   : > { %v351_v60 = vpop.f32.mrf.mxu0  ;;  %v448_v62 = vpop.f32.mrf.mxu1 }
  0xf1   : > { %1179 = vmatprep.subr.msk.mxu1 %vm489_vm2, %v351_v60 }
  0xf2   : > { %v353_v61 = vpop.f32.mrf.mxu0  ;;  %1180 = vmatpush3.msk.msra.mxu1 %vm489_vm2, %v351_v60  ;;  %v452_v63 = vpop.f32.mrf.mxu1 }
  0xf3   : > { %1158 = vmatprep.subr.msk.mxu0 %vm489_vm2, %v353_v61  ;;  %1181 = vmatprep.subr.mxu1 %v345_v56 }
  0xf4   : > { %1159 = vmatpush3.msk.msra.mxu0 %vm489_vm2, %v353_v61  ;;  %1182 = vmatpush3.msra.mxu1 %v345_v56  ;;  %v454_v0 = vpop.f32.mrf.mxu1 }
  0xf5   : > { %1160 = vmatprep.subr.mxu0 %v347_v58  ;;  %1183 = vmatprep.subr.mxu1 %v339_v52 }
  0xf6   : > { %1161 = vmatpush3.msra.mxu0 %v347_v58  ;;  %1184 = vmatpush3.msra.mxu1 %v339_v52 }
  0xf7   : > { %1162 = vmatprep.subr.mxu0 %v341_v54  ;;  %1185 = vmatprep.subr.mxu1 %v333_v48 }
  0xf8   : > { %1163 = vmatpush3.msra.mxu0 %v341_v54  ;;  %1186 = vmatpush3.msra.mxu1 %v333_v48 }
  0xf9   : > { %1164 = vmatprep.subr.mxu0 %v335_v50  ;;  %1187 = vmatprep.subr.mxu1 %v327_v44 }
  0xfa   : > { %1165 = vmatpush3.msra.mxu0 %v335_v50  ;;  %1188 = vmatpush3.msra.mxu1 %v327_v44 }
  0xfb   : > { %1166 = vmatprep.subr.mxu0 %v329_v46  ;;  %1189 = vmatprep.subr.mxu1 %v321_v41 }
  0xfc   : > { %1167 = vmatpush3.msra.mxu0 %v329_v46  ;;  %1190 = vmatpush3.msra.mxu1 %v321_v41  ;;  %v1107_v41 = vld [vmem:[%s1576_s3] ss:$0 sm:$0xff] }
  0xfd   : > { %1168 = vmatprep.subr.mxu0 %v323_v42  ;;  %1221 = vmatprep.subr.msk.mxu1 %vm489_vm2, %v454_v0 }
  0xfe   : > { %1169 = vmatpush3.msra.mxu0 %v323_v42  ;;  %1192 = vmatmul.mubr.msk.f32.vlgmr.msra.gmra.mxu1 %vm470_vm1, %v458_v1 }
  0xff   : > { %1222 = vmatpush3.msk.msra.mxu1 %vm489_vm2, %v454_v0  ;;  %1200 = vmatprep.subr.msk.mxu0 %vm489_vm2, %v452_v63 }
 0x100   : > { %1223 = vmatprep.subr.mxu1 %v448_v62  ;;  %1171 = vmatmul.mubr.msk.f32.vlgmr.msra.gmra.mxu0 %vm470_vm1, %v1062_v2 }
 0x101   : > { %1201 = vmatpush3.msk.msra.mxu0 %vm489_vm2, %v452_v63  ;;  %1224 = vmatpush3.msra.mxu1 %v448_v62 }
 0x102   : > { %1202 = vmatprep.subr.mxu0 %v446_v59  ;;  %1225 = vmatprep.subr.mxu1 %v442_v57 }
 0x103   : > { %1203 = vmatpush3.msra.mxu0 %v446_v59  ;;  %1226 = vmatpush3.msra.mxu1 %v442_v57 }
 0x104   : > { %1173 = vmatprep.mubr.msk.f32.mxu0 %vm470_vm1, %v1063_v3  ;;  %1204 = vmatprep.subr.mxu0 %v440_v55 }
 0x105   : > { %1227 = vmatprep.subr.mxu1 %v436_v53  ;;  %1174 = vmatmul.mubr.msk.f32.gmra.mxu0 %vm470_vm1, %v1064_v4 }
 0x106   : > { %1205 = vmatpush3.msra.mxu0 %v440_v55  ;;  %1228 = vmatpush3.msra.mxu1 %v436_v53 }
 0x107   : > { %1194 = vmatprep.mubr.msk.f32.mxu1 %vm470_vm1, %v459_v5  ;;  %1206 = vmatprep.subr.mxu0 %v1446_v51 }
 0x108   : > { %1229 = vmatprep.subr.mxu1 %v1444_v49  ;;  %1195 = vmatmul.mubr.msk.f32.gmra.mxu1 %vm470_vm1, %v460_v6 }
 0x109   : > { %1207 = vmatpush3.msra.mxu0 %v1446_v51  ;;  %1230 = vmatpush3.msra.mxu1 %v1444_v49 }
 0x10a   : > { %1176 = vmatprep.mubr.msk.f32.mxu0 %vm470_vm1, %v1065_v7  ;;  %1208 = vmatprep.subr.mxu0 %v1442_v47 }
 0x10b   : > { %1231 = vmatprep.subr.mxu1 %v1440_v45  ;;  %1177 = vmatmul.mubr.msk.f32.gmra.mxu0 %vm470_vm1, %v1066_v8 }
 0x10c   : > { %1209 = vmatpush3.msra.mxu0 %v1442_v47  ;;  %1232 = vmatpush3.msra.mxu1 %v1440_v45 }
 0x10d   : > { %1197 = vmatprep.mubr.msk.f32.mxu1 %vm470_vm1, %v461_v9  ;;  %1210 = vmatprep.subr.mxu0 %v1438_v43 }
 0x10e   : > { %1198 = vmatmul.mubr.msk.f32.gmra.mxu1 %vm470_vm1, %v462_v10  ;;  %1211 = vmatpush3.msra.mxu0 %v1438_v43 }
 0x10f   : > { %1212 = vmatprep.mubr.msk.f32.mxu0 %vm470_vm1, %v1081_v11  ;;  %1233 = vmatprep.mubr.msk.f32.mxu1 %vm470_vm1, %v1094_v12 }
 0x110   : > { %1213 = vmatmul.mubr.msk.f32.vlgmr.msra.gmra.mxu0 %vm470_vm1, %v1082_v13 }
 0x111   : > { %1215 = vmatprep.mubr.msk.f32.mxu0 %vm470_vm1, %v1083_v14 }
 0x112   : > { %1234 = vmatmul.mubr.msk.f32.vlgmr.msra.gmra.mxu1 %vm470_vm1, %v1095_v15 }
 0x113   : > { %1236 = vmatprep.mubr.msk.f32.mxu1 %vm470_vm1, %v1096_v16 }
 0x114   : > { %1216 = vmatmul.mubr.msk.f32.gmra.mxu0 %vm470_vm1, %v1084_v17 }
 0x115   : > { %1218 = vmatprep.mubr.msk.f32.mxu0 %vm470_vm1, %v1085_v18 }
 0x116   : > { %1237 = vmatmul.mubr.msk.f32.gmra.mxu1 %vm470_vm1, %v1097_v19 }
 0x117   : > { %1239 = vmatprep.mubr.msk.f32.mxu1 %vm470_vm1, %v1098_v20 }
 0x118   : > { %1219 = vmatmul.mubr.msk.f32.gmra.mxu0 %vm470_vm1, %v1086_v21 }
 0x11a   : > { %1240 = vmatmul.mubr.msk.f32.gmra.mxu1 %vm470_vm1, %v1099_v22 }
 0x1be   : > { %v1193_v24 = vpop.f32.mrf.mxu1 }
 0x1c0   : > { %v1172_v23 = vpop.f32.mrf.mxu0  ;;  %v675_v26 = vpop.f32.mrf.mxu1 }
 0x1c1   : > { %v681_v34 = vadd.f32 %v1193_v24, %v1172_v23 }
 0x1c2   : > { %v559_v25 = vpop.f32.mrf.mxu0 }
 0x1c3   : > { %v676_v37 = vadd.f32 %v675_v26, %v559_v25 }
 0x1c5   : > { %v1175_v27 = vpop.f32.mrf.mxu0 }
 0x1c7   : > { %v569_v28 = vpop.f32.mrf.mxu0 }
 0x1c8   : > { %v1196_v29 = vpop.f32.mrf.mxu1 }
 0x1c9   : > { %v691_v42 = vadd.f32 %v1196_v29, %v1175_v27 }
 0x1ca   : > { %v685_v30 = vpop.f32.mrf.mxu1 }
 0x1cb   : > { %v1178_v31 = vpop.f32.mrf.mxu0  ;;  %v686_v47 = vadd.f32 %v685_v30, %v569_v28 }
 0x1cd   : > { %v579_v32 = vpop.f32.mrf.mxu0 }
 0x1ce   : > { %v1199_v33 = vpop.f32.mrf.mxu1 }
 0x1cf   : > { %v701_v51 = vadd.f32 %v1199_v33, %v1178_v31 }
 0x1d0   : > { %v695_v35 = vpop.f32.mrf.mxu1  ;;  %v1214_v36 = vpop.f32.mrf.mxu0 }
 0x1d1   : > { %v828_v38 = vadd.f32 %v1214_v36, %v681_v34  ;;  %v696_v58 = vadd.f32 %v695_v35, %v579_v32 }
 0x1d2   : > { %v798_v39 = vpop.f32.mrf.mxu0  ;;  %v1235_v40 = vpop.f32.mrf.mxu1 }
 0x1d3   : > { %v827_v43 = vadd.f32 %v798_v39, %v676_v37  ;;  %v957_v44 = vadd.f32 %v1235_v40, %v828_v38 }
 0x1d4   : > { %v1217_v45 = vpop.f32.mrf.mxu0  ;;  %v927_v46 = vpop.f32.mrf.mxu1 }
 0x1d5   : > { %v970_v48 = vadd.f32 %v1107_v41, %v957_v44  ;;  %v830_v49 = vadd.f32 %v1217_v45, %v691_v42  ;;  %v956_v50 = vadd.f32 %v927_v46, %v827_v43 }
 0x1d6   : > { %v808_v52 = vpop.f32.mrf.mxu0  ;;  %v1238_v53 = vpop.f32.mrf.mxu1 }
 0x1d7   : > { %v976_v54 = vmax.f32 %v970_v48, 0.0  ;;  %v969_v55 = vadd.f32 %v1107_v41, %v956_v50  ;;  %v829_v56 = vadd.f32 %v808_v52, %v686_v47  ;;  %v959_v57 = vadd.f32 %v1238_v53, %v830_v49 }
 0x1d8   : > { %v1220_v59 = vpop.f32.mrf.mxu0  ;;  %v937_v60 = vpop.f32.mrf.mxu1 }
 0x1d9   : > { %982 = vst [vmem:[%s1562_s20 + $0x8] sm:$0xff] %v976_v54  ;;  %v975_v61 = vmax.f32 %v969_v55, 0.0  ;;  %v972_v62 = vadd.f32 %v1107_v41, %v959_v57  ;;  %v832_v63 = vadd.f32 %v1220_v59, %v701_v51  ;;  %v958_v0 = vadd.f32 %v937_v60, %v829_v56 }
 0x1da   : > { %v818_v1 = vpop.f32.mrf.mxu0  ;;  %v1241_v2 = vpop.f32.mrf.mxu1 }
 0x1db   : > { %981 = vst [vmem:[%s1562_s20] sm:$0xff] %v975_v61  ;;  %v978_v3 = vmax.f32 %v972_v62, 0.0  ;;  %v971_v4 = vadd.f32 %v1107_v41, %v958_v0  ;;  %v831_v5 = vadd.f32 %v818_v1, %v696_v58  ;;  %v961_v6 = vadd.f32 %v1241_v2, %v832_v63 }
 0x1dc   : > { %v947_v7 = vpop.f32.mrf.mxu1 }
 0x1dd   : > { %984 = vst [vmem:[%s1562_s20 + $0x18] sm:$0xff] %v978_v3  ;;  %v977_v8 = vmax.f32 %v971_v4, 0.0  ;;  %v974_v9 = vadd.f32 %v1107_v41, %v961_v6  ;;  %v960_v10 = vadd.f32 %v947_v7, %v831_v5 }
 0x1df   : > { %983 = vst [vmem:[%s1562_s20 + $0x10] sm:$0xff] %v977_v8  ;;  %v980_v11 = vmax.f32 %v974_v9, 0.0  ;;  %v973_v12 = vadd.f32 %v1107_v41, %v960_v10 }
 0x1e1   : > { %986 = vst [vmem:[%s1562_s20 + $0x28] sm:$0x7] %v980_v11  ;;  %v979_v13 = vmax.f32 %v973_v12, 0.0 }
 0x1e3   : > { %985 = vst [vmem:[%s1562_s20 + $0x20] sm:$0xff] %v979_v13 }
 0x1e4 PF: > { %s14_s15 = sadd.s32 1, %s1258_s15  }
 0x1e5   : > { %p11_p4 = scmp.ge.s32.totalorder %s14_s15, 4  }
 0x1e7   :  { %13 = sbr.rel (!%p11_p4) target bundleno = 1 (0x1), region = 69 }

</bundles_post_ra>
